<compile_context>
chip_gen: v7x
topology: tpu7x:2x2x1
jax: 0.10.0
libtpu: 0.0.40
codegen_flags: <defaults>
</compile_context>

<pallas_src>
import functools
import math

import jax
import jax.numpy as jnp
from jax import lax
from jax.experimental import pallas as pl
from jax.experimental.pallas import tpu as pltpu

S_SCALE = 1.8
EPS = 1e-12  # F.normalize eps


def _round_up(x, m):
    return ((x + m - 1) // m) * m


def _sublane(dtype):
    # Minimum sublane multiple for a 2-D tile of this dtype.
    return {4: 8, 2: 16, 1: 32}.get(jnp.dtype(dtype).itemsize, 8)


def _vmem_capacity_bytes():
    try:
        cap = getattr(pltpu.get_tpu_info(), "vmem_capacity_bytes", None)
        if cap:
            return int(cap)
    except Exception:
        pass
    return 64 * 1024 * 1024  # conservative fallback (v7x per-core VMEM)


def _as_compute(a, cdt):
    # int-stored A (e.g. 0/1 adjacency kept as int8 in HBM) -> float via f32,
    # then to the compute dtype.  No-op when a is already the compute dtype.
    if jnp.issubdtype(a.dtype, jnp.integer):
        a = a.astype(jnp.float32)
    return a.astype(cdt)


# ----------------------------------------------------------------------------
# Kernels
# ----------------------------------------------------------------------------
def _linear_normalize_kernel(x_ref, w_ref, h_ref, *, cdt):
    # H_tile = row-L2-normalize(X_tile @ W)  (MXU matmul + rsqrt epilogue).
    h = jnp.dot(x_ref[...].astype(cdt), w_ref[...].astype(cdt),
                preferred_element_type=jnp.float32)
    ss = jnp.sum(h * h, axis=-1, keepdims=True)
    # rsqrt(max(ss, EPS^2)) == 1 / max(||h||, EPS)  (F.normalize semantics).
    h_ref[...] = (h * lax.rsqrt(jnp.maximum(ss, EPS * EPS))).astype(h_ref.dtype)


def _scaled_matmul_single_kernel(a_ref, h_ref, o_ref, *, s, cdt):
    # out = s * (A_tile @ H_tile), single K step -> no accumulation needed.
    o_ref[...] = (s * jnp.dot(_as_compute(a_ref[...], cdt), h_ref[...],
                              preferred_element_type=jnp.float32)
                  ).astype(o_ref.dtype)


def _scaled_matmul_acc_kernel(a_ref, h_ref, o_ref, *, s, cdt):
    # out = s * (A @ H), tiled over K, accumulating directly into the
    # k-invariant f32 output block (no accumulator scratch).
    @pl.when(pl.program_id(2) == 0)
    def _():
        o_ref[...] = jnp.zeros_like(o_ref)

    o_ref[...] += jnp.dot(_as_compute(a_ref[...], cdt), h_ref[...],
                          preferred_element_type=jnp.float32)

    @pl.when(pl.program_id(2) == pl.num_programs(2) - 1)
    def _():
        o_ref[...] = o_ref[...] * s


def _gncn_fused_kernel(x_ref, w_ref, a_ref, o_ref, h_ref, *, s, cdt):
    # Fused: H = normalize(X @ W) into a VMEM scratch at the first step of the
    # inner ("arbitrary") axis, then each step does out_tile = s * (A_tile @ H).
    # The fill is re-run for every index of the leading "parallel" axis so that
    # each v7x TensorCore owns a correctly initialized copy of H.
    @pl.when(pl.program_id(1) == 0)
    def _():
        h = jnp.dot(x_ref[...].astype(cdt), w_ref[...].astype(cdt),
                    preferred_element_type=jnp.float32)
        ss = jnp.sum(h * h, axis=-1, keepdims=True)
        h_ref[...] = (h * lax.rsqrt(jnp.maximum(ss, EPS * EPS))
                      ).astype(h_ref.dtype)

    o_ref[...] = (s * jnp.dot(_as_compute(a_ref[...], cdt), h_ref[...],
                              preferred_element_type=jnp.float32)
                  ).astype(o_ref.dtype)


# ----------------------------------------------------------------------------
# Wrappers
# ----------------------------------------------------------------------------
def _fused_call(A_p, X_p, W_p, *, s, cdt, tm, out_dtype, vmem_limit):
    N_pad, F_in_pad = X_p.shape
    F_out_pad = W_p.shape[1]
    steps = N_pad // tm
    # 2-way split across the leading "parallel" axis so v7x's two TensorCores
    # both run; on v5e/v6e the single core just repeats the tiny X@W fill.
    n_split = 2 if (steps % 2 == 0 and steps >= 2) else 1
    steps_per = steps // n_split

    return pl.pallas_call(
        functools.partial(_gncn_fused_kernel, s=s, cdt=cdt),
        out_shape=jax.ShapeDtypeStruct((N_pad, F_out_pad), out_dtype),
        grid_spec=pltpu.PrefetchScalarGridSpec(
            num_scalar_prefetch=0,
            grid=(n_split, steps_per),
            in_specs=[
                pl.BlockSpec((N_pad, F_in_pad), lambda p, i: (0, 0)),
                pl.BlockSpec((F_in_pad, F_out_pad), lambda p, i: (0, 0)),
                pl.BlockSpec((tm, N_pad), lambda p, i: (p * steps_per + i, 0)),
            ],
            out_specs=pl.BlockSpec((tm, F_out_pad),
                                   lambda p, i: (p * steps_per + i, 0)),
            scratch_shapes=[pltpu.VMEM((N_pad, F_out_pad), cdt)],
        ),
        compiler_params=pltpu.CompilerParams(
            dimension_semantics=("parallel", "arbitrary"),
            vmem_limit_bytes=vmem_limit),
    )(X_p, W_p, A_p)


def _two_stage_call(A_p, X_p, W_p, *, s, cdt, tm, tn, tk, out_dtype,
                    vmem_limit):
    N_pad, F_in_pad = X_p.shape
    F_out_pad = W_p.shape[1]

    # Stage 1: H = normalize(X @ W), tiled over rows of X.
    h = pl.pallas_call(
        functools.partial(_linear_normalize_kernel, cdt=cdt),
        out_shape=jax.ShapeDtypeStruct((N_pad, F_out_pad), cdt),
        grid_spec=pltpu.PrefetchScalarGridSpec(
            num_scalar_prefetch=0,
            grid=(N_pad // tm,),
            in_specs=[pl.BlockSpec((tm, F_in_pad), lambda i: (i, 0)),
                      pl.BlockSpec((F_in_pad, F_out_pad), lambda i: (0, 0))],
            out_specs=pl.BlockSpec((tm, F_out_pad), lambda i: (i, 0)),
        ),
        compiler_params=pltpu.CompilerParams(
            dimension_semantics=("parallel",),
            vmem_limit_bytes=vmem_limit),
    )(X_p, W_p)

    gm, gn, gk = N_pad // tm, F_out_pad // tn, N_pad // tk

    if gk == 1:
        # Single K step: no accumulation, no init/finalize branches.
        return pl.pallas_call(
            functools.partial(_scaled_matmul_single_kernel, s=s, cdt=cdt),
            out_shape=jax.ShapeDtypeStruct((N_pad, F_out_pad), out_dtype),
            grid_spec=pltpu.PrefetchScalarGridSpec(
                num_scalar_prefetch=0,
                grid=(gm, gn),
                in_specs=[pl.BlockSpec((tm, tk), lambda i, j: (i, 0)),
                          pl.BlockSpec((tk, tn), lambda i, j: (0, j))],
                out_specs=pl.BlockSpec((tm, tn), lambda i, j: (i, j)),
            ),
            compiler_params=pltpu.CompilerParams(
                dimension_semantics=("parallel", "parallel"),
                vmem_limit_bytes=vmem_limit),
        )(A_p, h)

    out32 = pl.pallas_call(
        functools.partial(_scaled_matmul_acc_kernel, s=s, cdt=cdt),
        out_shape=jax.ShapeDtypeStruct((N_pad, F_out_pad), jnp.float32),
        grid_spec=pltpu.PrefetchScalarGridSpec(
            num_scalar_prefetch=0,
            grid=(gm, gn, gk),
            in_specs=[pl.BlockSpec((tm, tk), lambda i, j, k: (i, k)),
                      pl.BlockSpec((tk, tn), lambda i, j, k: (k, j))],
            out_specs=pl.BlockSpec((tm, tn), lambda i, j, k: (i, j)),
        ),
        compiler_params=pltpu.CompilerParams(
            dimension_semantics=("parallel", "parallel", "arbitrary"),
            vmem_limit_bytes=vmem_limit),
    )(A_p, h)
    if out32.dtype != jnp.dtype(out_dtype):
        out32 = out32.astype(out_dtype)
    return out32


def gncn_forward(A, X, W, *, s=S_SCALE, compute_dtype=jnp.bfloat16,
                 a_store_dtype=None, out_dtype=jnp.float32,
                 fuse=None, tm=None, tn=None, tk=None):
    """GNCN forward:  s * A @ normalize(X @ W)   (dropout p=0, identity act).

    a_store_dtype: HBM storage dtype for A.  Default: the compute dtype (cast
      fused into the pad copy).  Pass jnp.int8 for 0/1 adjacencies to cut the
      dominant A stream a further 2x.
    """
    N, F_in = X.shape
    F_out = W.shape[1]
    assert A.shape == (N, N)
    cdt = jnp.dtype(compute_dtype)
    out_dtype = jnp.dtype(out_dtype)
    a_store = jnp.dtype(a_store_dtype) if a_store_dtype is not None else cdt

    # --- padding granularity, decoupled from tile size (bounds N^2 waste) ---
    if N >= 4096:
        gran = 512
    elif N >= 1024:
        gran = 256
    else:
        gran = 128
    N_pad = _round_up(N, gran)

    # --- tile selection: MXU-shaped divisors of N_pad, <= 512 ---
    def _pick_tile():
        for cand in (512, 384, 256, 128):
            if N_pad % cand == 0:
                return cand
        return N_pad  # unreachable: N_pad is a multiple of 128

    if tm is None:
        tm = _pick_tile()
    if tk is None:
        tk = _pick_tile()
    if N_pad % tm != 0 or N_pad % tk != 0:      # user-supplied odd tiles
        N_pad = _round_up(N_pad, math.lcm(tm, tk))

    f_out_128 = _round_up(F_out, 128)
    if tn is None:
        # Keep a single output-column step for F_out up to 1024 so the N x N
        # A matrix is streamed from HBM exactly once.
        tn = f_out_128 if f_out_128 <= 1024 else 512
    F_in_pad = _round_up(F_in, 128)
    F_out_pad = _round_up(F_out, tn)

    # --- layout sanity (Mosaic minimum sublane tiles per dtype) ---
    min_sub = max(_sublane(cdt), _sublane(a_store), 8)
    assert tm % min_sub == 0, f"tm={tm} must be a multiple of {min_sub}"
    assert tn % 128 == 0 and tk % 128 == 0

    # --- pad; fuse the A cast into the pad copy when a copy happens anyway ---
    if N_pad != N:
        A_p = jnp.pad(A, ((0, N_pad - N), (0, N_pad - N))).astype(a_store)
    elif a_store_dtype is not None and A.dtype != a_store:
        A_p = A.astype(a_store)                 # explicit storage request
    else:
        A_p = A                                 # no extra HBM pass; cast in-kernel
    X_p = jnp.pad(X, ((0, N_pad - N), (0, F_in_pad - F_in))).astype(cdt)
    W_p = jnp.pad(W, ((0, F_in_pad - F_in), (0, F_out_pad - F_out))).astype(cdt)

    # --- generation-aware VMEM budget ---
    vmem_cap = _vmem_capacity_bytes()
    vmem_limit = int(min(vmem_cap * 0.75, 100 * 1024 * 1024))

    # --- fused single-call path when everything comfortably fits in VMEM ---
    if fuse is None:
        fused_bytes = (2 * X_p.size * X_p.dtype.itemsize
                       + 2 * W_p.size * W_p.dtype.itemsize
                       + 2 * tm * N_pad * A_p.dtype.itemsize
                       + 2 * tm * F_out_pad * out_dtype.itemsize
                       + N_pad * F_out_pad * cdt.itemsize)
        fuse = fused_bytes <= int(vmem_limit * 0.9)

    if fuse:
        out = _fused_call(A_p, X_p, W_p, s=s, cdt=cdt, tm=tm,
                          out_dtype=out_dtype, vmem_limit=vmem_limit)
    else:
        out = _two_stage_call(A_p, X_p, W_p, s=s, cdt=cdt, tm=tm, tn=tn, tk=tk,
                              out_dtype=out_dtype, vmem_limit=vmem_limit)

    return out[:N, :F_out]


def gncn_reference(A, X, W, *, s=S_SCALE):
    h = X @ W
    nrm = jnp.maximum(jnp.sqrt(jnp.sum(h * h, axis=-1, keepdims=True)), EPS)
    return s * (A @ (h / nrm))


if __name__ == "__main__":
    key = jax.random.PRNGKey(0)
    k_a, k_x, k_w = jax.random.split(key, 3)

    # Non-tile-multiple shapes on purpose: exercises the padding path.
    N, F_in, F_out = 200, 96, 80

    # Dense 0/1 "adjacency-like" matrix and node features.
    A = (jax.random.uniform(k_a, (N, N), jnp.float32) < 0.1).astype(jnp.float32)
    X = jax.random.normal(k_x, (N, F_in), dtype=jnp.float32)

    # Deterministic Linear(in, out, bias=False) init: U(-1/sqrt(in), 1/sqrt(in)),
    # PyTorch weight shape [out, in]; stored pre-transposed as [in, out].
    bound = 1.0 / (F_in ** 0.5)
    W_pt = jax.random.uniform(k_w, (F_out, F_in), jnp.float32, -bound, bound)
    W = W_pt.T

    ref = gncn_reference(A, X, W)

    # 1) Default fast path: fused single pallas_call, bf16 compute/storage.
    out_fast = jax.block_until_ready(gncn_forward(A, X, W))
    assert out_fast.shape == (N, F_out)
    assert jnp.allclose(out_fast, ref, atol=3e-2, rtol=3e-2), "bf16 fused mismatch"

    # 2) f32-faithful path (matches the PyTorch module's f32 math tightly).
    out_f32 = jax.block_until_ready(
        gncn_forward(A, X, W, compute_dtype=jnp.float32))
    assert jnp.allclose(out_f32, ref, atol=1e-4, rtol=1e-4), "f32 fused mismatch"

    # 3) Fused path with a 2-way "parallel" split (v7x 2-TensorCore layout)
    #    and bf16 output writeback.
    out_split = jax.block_until_ready(
        gncn_forward(A, X, W, tm=128, fuse=True, out_dtype=jnp.bfloat16))
    assert jnp.allclose(out_split.astype(jnp.float32), ref,
                        atol=6e-2, rtol=6e-2), "fused split / bf16-out mismatch"

    # 4) int8 adjacency storage (0/1 matrix), bf16 compute.
    out_i8 = jax.block_until_ready(
        gncn_forward(A, X, W, a_store_dtype=jnp.int8))
    assert jnp.allclose(out_i8, ref, atol=3e-2, rtol=3e-2), "int8-A mismatch"

    # 5) Two-stage path, single-K-step (no accumulation) variant, bf16.
    out_two_single = jax.block_until_ready(gncn_forward(A, X, W, fuse=False))
    assert jnp.allclose(out_two_single, ref, atol=3e-2, rtol=3e-2), \
        "two-stage single-K mismatch"

    # 6) Two-stage path with a multi-step K reduction (direct f32 output
    #    accumulation), forced via small tiles.
    out_two_acc = jax.block_until_ready(
        gncn_forward(A, X, W, compute_dtype=jnp.float32, fuse=False,
                     tm=128, tn=128, tk=128))
    assert jnp.allclose(out_two_acc, ref, atol=1e-4, rtol=1e-4), \
        "two-stage acc mismatch"

    print("KERNEL_OK")
</pallas_src>

<mosaic_0001>
module attributes {stable_mosaic.version = 11 : i64} {
  func.func @_gncn_fused_kernel(%arg0: i32, %arg1: i32, %arg2: memref<256x128xbf16, #tpu.memory_space<vmem>>, %arg3: memref<128x128xbf16, #tpu.memory_space<vmem>>, %arg4: memref<256x256xbf16, #tpu.memory_space<vmem>>, %arg5: memref<256x128xf32, #tpu.memory_space<vmem>>, %arg6: memref<256x128xbf16, #tpu.memory_space<vmem>>) attributes {dimension_semantics = [#tpu.dimension_semantics<parallel>, #tpu.dimension_semantics<arbitrary>], iteration_bounds = array<i64: 1, 1>, scalar_prefetch = 0 : i64, scratch_operands = 1 : i64, tpu.core_type = #tpu.core_type<tc>, window_params = [{pipeline_mode = #tpu.pipeline_mode<synchronous>, transform_indices = @transform_0, window_bounds = array<i64: 256, 128>}, {pipeline_mode = #tpu.pipeline_mode<synchronous>, transform_indices = @transform_1, window_bounds = array<i64: 128, 128>}, {transform_indices = @transform_2, window_bounds = array<i64: 256, 256>}, {transform_indices = @transform_3, window_bounds = array<i64: 256, 128>}]} {
    %c0_i32 = arith.constant 0 : i32
    %0 = arith.cmpi eq, %arg1, %c0_i32 : i32
    %1 = arith.extui %0 : i1 to i32
    %c0_i32_0 = arith.constant 0 : i32
    %2 = arith.cmpi ne, %1, %c0_i32_0 : i32
    scf.if %2 {
      %c0_7 = arith.constant 0 : index
      %c0_8 = arith.constant 0 : index
      %9 = vector.load %arg2[%c0_7, %c0_8] : memref<256x128xbf16, #tpu.memory_space<vmem>>, vector<256x128xbf16>
      %c0_9 = arith.constant 0 : index
      %c0_10 = arith.constant 0 : index
      %10 = vector.load %arg3[%c0_9, %c0_10] : memref<128x128xbf16, #tpu.memory_space<vmem>>, vector<128x128xbf16>
      %cst_11 = arith.constant dense<0.000000e+00> : vector<256x128xf32>
      %11 = tpu.matmul %9, %10, %cst_11 {dimension_numbers = #tpu.dot_dimension_numbers<[1], [0], [0], [1], [0, 0, 1, 1], [], []>} : vector<256x128xbf16>, vector<128x128xbf16>, vector<256x128xf32> -> vector<256x128xf32>
      %12 = arith.mulf %11, %11 : vector<256x128xf32>
      %cst_12 = arith.constant dense<0.000000e+00> : vector<256xf32>
      %13 = vector.multi_reduction <add>, %12, %cst_12 [1] : vector<256x128xf32> to vector<256xf32>
      %14 = vector.shape_cast %13 : vector<256xf32> to vector<256x1xf32>
      %cst_13 = arith.constant 1.000000e-24 : f32
      %15 = vector.broadcast %cst_13 : f32 to vector<256x1xf32>
      %16 = arith.maximumf %14, %15 : vector<256x1xf32>
      %17 = math.rsqrt %16 : vector<256x1xf32>
      %18 = vector.broadcast %17 : vector<256x1xf32> to vector<256x128xf32>
      %19 = arith.mulf %11, %18 : vector<256x128xf32>
      %20 = arith.truncf %19 : vector<256x128xf32> to vector<256x128xbf16>
      %c0_14 = arith.constant 0 : index
      %c0_15 = arith.constant 0 : index
      %21 = vector.load %arg6[%c0_14, %c0_15] : memref<256x128xbf16, #tpu.memory_space<vmem>>, vector<256x128xbf16>
      tpu.vector_store %arg6[%c0_14, %c0_15], %20 {strides = array<i32>} : memref<256x128xbf16, #tpu.memory_space<vmem>>, vector<256x128xbf16>,
    } else {
    }
    %c0 = arith.constant 0 : index
    %c0_1 = arith.constant 0 : index
    %3 = vector.load %arg4[%c0, %c0_1] : memref<256x256xbf16, #tpu.memory_space<vmem>>, vector<256x256xbf16>
    %c0_2 = arith.constant 0 : index
    %c0_3 = arith.constant 0 : index
    %4 = vector.load %arg6[%c0_2, %c0_3] : memref<256x128xbf16, #tpu.memory_space<vmem>>, vector<256x128xbf16>
    %cst = arith.constant dense<0.000000e+00> : vector<256x128xf32>
    %5 = tpu.matmul %3, %4, %cst {dimension_numbers = #tpu.dot_dimension_numbers<[1], [0], [0], [1], [0, 0, 1, 1], [], []>} : vector<256x256xbf16>, vector<256x128xbf16>, vector<256x128xf32> -> vector<256x128xf32>
    %cst_4 = arith.constant 1.800000e+00 : f32
    %6 = vector.broadcast %cst_4 : f32 to vector<256x128xf32>
    %7 = arith.mulf %6, %5 : vector<256x128xf32>
    %c0_5 = arith.constant 0 : index
    %c0_6 = arith.constant 0 : index
    %8 = vector.load %arg5[%c0_5, %c0_6] : memref<256x128xf32, #tpu.memory_space<vmem>>, vector<256x128xf32>
    tpu.vector_store %arg5[%c0_5, %c0_6], %7 {strides = array<i32>} : memref<256x128xf32, #tpu.memory_space<vmem>>, vector<256x128xf32>,
    return
  }
  func.func @transform_0(%arg0: i32, %arg1: i32) -> (i32, i32) {
    %c0_i32 = arith.constant 0 : i32
    %c0_i32_0 = arith.constant 0 : i32
    %c0_i32_1 = arith.constant 0 : i32
    return %c0_i32, %c0_i32_0 : i32, i32
  }
  func.func @transform_1(%arg0: i32, %arg1: i32) -> (i32, i32) {
    %c0_i32 = arith.constant 0 : i32
    %c0_i32_0 = arith.constant 0 : i32
    %c0_i32_1 = arith.constant 0 : i32
    return %c0_i32, %c0_i32_0 : i32, i32
  }
  func.func @transform_2(%arg0: i32, %arg1: i32) -> (i32, i32) {
    %c1_i32 = arith.constant 1 : i32
    %0 = arith.muli %arg0, %c1_i32 : i32
    %1 = arith.addi %0, %arg1 : i32
    %c0_i32 = arith.constant 0 : i32
    %c0_i32_0 = arith.constant 0 : i32
    return %1, %c0_i32 : i32, i32
  }
  func.func @transform_3(%arg0: i32, %arg1: i32) -> (i32, i32) {
    %c1_i32 = arith.constant 1 : i32
    %0 = arith.muli %arg0, %c1_i32 : i32
    %1 = arith.addi %0, %arg1 : i32
    %c0_i32 = arith.constant 0 : i32
    %c0_i32_0 = arith.constant 0 : i32
    return %1, %c0_i32 : i32, i32
  }
}

</mosaic_0001>

<bundles_post_ra>
// kernel: tpu_custom_call.1
= control target key start
LH: loop header
LB: loop body
LE: loop exit
PB: predicated region body
PF: predicated region fallthrough
CT: control target
= control target key end

     0   :  { %8 = vsyncpa [#allocation4], 0  ;;  %s1869_s0 = inlined_call_operand.hbm [shape: bf16[256,128], index: 0, kind: input, shape index: {}]   ;;  %s1870_s1 = inlined_call_operand.hbm [shape: bf16[128,128], index: 1, kind: input, shape index: {}]   ;;  %s1871_s2 = inlined_call_operand.hbm [shape: bf16[256,256], index: 2, kind: input, shape index: {}]   ;;  %s1872_s3 = inlined_call_operand.hbm [shape: f32[256,128], index: 3, kind: output, shape index: {}]  }
   0x1   :  { %9 = vsyncpa [#allocation7], 0 }
   0x2   :  { %10 = vsyncpa [#allocation5], 0  ;;  %s1596_s12 = smov [#allocation6]   ;;  %s1597_s14 = smov [#allocation3]  }
   0x3   :  { %s28_s13 = sshll.u32 %s1596_s12, 4  ;;  %s16_s15 = sshll.u32 %s1597_s14, 4  ;;  %s29_s13 = int_to_ptr.vmem [resolvable:$true] %s28_s13  ;;  %s1624_s15 = int_to_ptr.vmem [resolvable:$true] %s16_s15 }
   0x4   :  { %s1502_s18 = scalar_lea.hbm %s1870_s1, 1024 }
   0x5   :  { %p1503_p0 = scmp.ne.s32.totalorder %s1870_s1, %s1502_s18  ;;  %p1506_p1 = scmp.lt.u32.totalorder %s1502_s18, %s1870_s1 }
   0x7   :  { %p1508_p2 = pnand %p1506_p1, %p1503_p0 }
   0x9   :  { %1511 = shalt.err (!%p1508_p2)
}
   0xa   :  { %s1512_s23 = scalar_lea.vmem %s29_s13, 1024  ;;  %p1517_p4 = scmp.lt.s32.totalorder %s29_s13, %s29_s13 }
   0xb   :  { %p1513_p3 = scmp.ne.s32.totalorder %s29_s13, %s1512_s23  ;;  %p1518_p5 = scmp.lt.s32.totalorder %s1512_s23, %s1512_s23 }
   0xd   :  { %p1519_p6 = por %p1518_p5, %p1517_p4 }
   0xf   :  { %p1520_p7 = pnand %p1519_p6, %p1513_p3 }
  0x11   :  { %1523 = shalt.err (!%p1520_p7)
}
  0x12   :  { %s1598_s24 = smov 64   ;;  %s1599_s25 = smov 4  }
  0x13   :  { %34 = dma.hbm_to_vmem [thread:$0]  %s1870_s1, 1024, %s29_s13, [#allocation7], %s1598_s24, %s1598_s24, %s1599_s25  }
  0x14   :  { %s1524_s30 = scalar_lea.hbm %s1869_s0, 2048 }
  0x15   :  { %p1525_p8 = scmp.ne.s32.totalorder %s1869_s0, %s1524_s30  ;;  %p1528_p9 = scmp.lt.u32.totalorder %s1524_s30, %s1869_s0 }
  0x17   :  { %p1530_p10 = pnand %p1528_p9, %p1525_p8 }
  0x19   :  { %1533 = shalt.err (!%p1530_p10)
}
  0x1a   :  { %s1534_s8 = scalar_lea.vmem %s1624_s15, 2048  ;;  %p1539_p12 = scmp.lt.s32.totalorder %s1624_s15, %s1624_s15 }
  0x1b   :  { %p1535_p11 = scmp.ne.s32.totalorder %s1624_s15, %s1534_s8  ;;  %p1540_p13 = scmp.lt.s32.totalorder %s1534_s8, %s1534_s8 }
  0x1d   :  { %p1541_p0 = por %p1540_p13, %p1539_p12 }
  0x1f   :  { %p1542_p1 = pnand %p1541_p0, %p1535_p11 }
  0x21   :  { %1545 = shalt.err (!%p1542_p1)
}
  0x22   :  { %22 = dma.hbm_to_vmem [thread:$0]  %s1869_s0, 2048, %s1624_s15, [#allocation4], %s1598_s24, %s1598_s24, %s1599_s25  }
  0x23   :  { %s1600_s10 = smov [#allocation8]   ;;  %s1546_s14 = scalar_lea.hbm %s1871_s2, 4096 }
  0x24   :  { %s45_s11 = sshll.u32 %s1600_s10, 4  ;;  %p1547_p2 = scmp.ne.s32.totalorder %s1871_s2, %s1546_s14  ;;  %s46_s11 = int_to_ptr.vmem [resolvable:$true] %s45_s11 }
  0x25   :  { %p1550_p3 = scmp.lt.u32.totalorder %s1546_s14, %s1871_s2 }
  0x27   :  { %p1552_p4 = pnand %p1550_p3, %p1547_p2 }
  0x29   :  { %1555 = shalt.err (!%p1552_p4)
}
  0x2a   :  { %s1556_s20 = scalar_lea.vmem %s46_s11, 4096  ;;  %p1561_p6 = scmp.lt.s32.totalorder %s46_s11, %s46_s11 }
  0x2b   :  { %p1557_p5 = scmp.ne.s32.totalorder %s46_s11, %s1556_s20  ;;  %p1562_p7 = scmp.lt.s32.totalorder %s1556_s20, %s1556_s20 }
  0x2d   :  { %p1563_p8 = por %p1562_p7, %p1561_p6 }
  0x2f   :  { %p1564_p9 = pnand %p1563_p8, %p1557_p5 }
  0x31   :  { %1567 = shalt.err (!%p1564_p9)
}
  0x32   :  { %s1601_s0 = smov 128   ;;  %s1602_s15 = smov 8  }
  0x33   :  { %51 = dma.hbm_to_vmem [thread:$0]  %s1871_s2, 4096, %s46_s11, [#allocation7], %s1601_s0, %s1601_s0, %s1602_s15  }
  0x34   :  { %1590 = dma.done.wait [#allocation4], 2048  }
  0x35   :  { %1591 = vsyncadd [#allocation4], 4294965248 }
  0x36   :  { %1592 = dma.done.wait [#allocation7], 5120  }
  0x37   :  { %1593 = vsyncadd [#allocation7], 4294962176  ;;  %v1366_v0 = vld [vmem:[#allocation6] sm:$0xff]   ;;  %v1367_v1 = vld [vmem:[#allocation6 + $0x8] sm:$0xff]   ;;  %s1603_s2 = smov [#allocation9]  }
  0x38   :  { %1294 = vmatprep.subr.bf16.mxu0 %v1366_v0  ;;  %v1368_v2 = vld [vmem:[#allocation6 + $0x10] sm:$0xff]   ;;  %v1369_v3 = vld [vmem:[#allocation6 + $0x18] sm:$0xff]   ;;  %v1374_v4 = vld [vmem:[#allocation3] sm:$0xff]   ;;  %s1089_s23 = sshll.u32 %s1603_s2, 4  ;;  %s1090_s23 = int_to_ptr.vmem [resolvable:$true] %s1089_s23 }
  0x39   :  { %1295 = vmatpush3.bf16.msra.mxu0 %v1366_v0  ;;  %1310 = vmatprep.mubr.bf16.mxu0 %v1374_v4  ;;  %v1370_v5 = vld [vmem:[#allocation6 + $0x20] sm:$0xff]   ;;  %v1371_v6 = vld [vmem:[#allocation6 + $0x28] sm:$0xff]   ;;  %v1372_v7 = vld [vmem:[#allocation6 + $0x30] sm:$0xff]   ;;  %s1568_s24 = scalar_lea.vmem %s1090_s23, 4096  ;;  %p1573_p11 = scmp.lt.s32.totalorder %s1090_s23, %s1090_s23 }
  0x3a   :  { %1296 = vmatprep.subr.bf16.mxu0 %v1367_v1  ;;  %v1373_v8 = vld [vmem:[#allocation6 + $0x38] sm:$0xff]   ;;  %v1375_v9 = vld [vmem:[#allocation3 + $0x8] sm:$0xff]   ;;  %v1376_v10 = vld [vmem:[#allocation3 + $0x10] sm:$0xff]   ;;  %p1569_p10 = scmp.ne.s32.totalorder %s1090_s23, %s1568_s24  ;;  %p1574_p12 = scmp.lt.s32.totalorder %s1568_s24, %s1568_s24 }
  0x3b   :  { %v1377_v11 = vld [vmem:[#allocation3 + $0x18] sm:$0xff]   ;;  %v1378_v12 = vld [vmem:[#allocation3 + $0x20] sm:$0xff]   ;;  %v1379_v13 = vld [vmem:[#allocation3 + $0x28] sm:$0xff]  }
  0x3c   :  { %v1380_v14 = vld [vmem:[#allocation3 + $0x30] sm:$0xff]   ;;  %v1381_v15 = vld [vmem:[#allocation3 + $0x38] sm:$0xff]   ;;  %v1382_v16 = vld [vmem:[#allocation3 + $0x40] sm:$0xff]   ;;  %p1575_p13 = por %p1574_p12, %p1573_p11 }
  0x3d   :  { %1297 = vmatpush3.bf16.msra.mxu0 %v1367_v1  ;;  %v1383_v17 = vld [vmem:[#allocation3 + $0x48] sm:$0xff]   ;;  %v1384_v18 = vld [vmem:[#allocation3 + $0x50] sm:$0xff]   ;;  %v1385_v19 = vld [vmem:[#allocation3 + $0x58] sm:$0xff]  }
  0x3e   :  { %1298 = vmatprep.subr.bf16.mxu0 %v1368_v2  ;;  %v1386_v20 = vld [vmem:[#allocation3 + $0x60] sm:$0xff]   ;;  %v1387_v21 = vld [vmem:[#allocation3 + $0x68] sm:$0xff]   ;;  %v1388_v22 = vld [vmem:[#allocation3 + $0x70] sm:$0xff]   ;;  %p1576_p0 = pnand %p1575_p13, %p1569_p10 }
  0x3f   :  { %v1389_v23 = vld [vmem:[#allocation3 + $0x78] sm:$0xff]  }
  0x41   :  { %1299 = vmatpush3.bf16.msra.mxu0 %v1368_v2 }
  0x42   :  { %1300 = vmatprep.subr.bf16.mxu0 %v1369_v3 }
  0x45   :  { %1301 = vmatpush3.bf16.msra.mxu0 %v1369_v3 }
  0x46   :  { %1302 = vmatprep.subr.bf16.mxu0 %v1370_v5 }
  0x49   :  { %1303 = vmatpush3.bf16.msra.mxu0 %v1370_v5 }
  0x4a   :  { %1304 = vmatprep.subr.bf16.mxu0 %v1371_v6 }
  0x4d   :  { %1305 = vmatpush3.bf16.msra.mxu0 %v1371_v6 }
  0x4e   :  { %1306 = vmatprep.subr.bf16.mxu0 %v1372_v7 }
  0x51   :  { %1307 = vmatpush3.bf16.msra.mxu0 %v1372_v7 }
  0x52   :  { %1308 = vmatprep.subr.bf16.mxu0 %v1373_v8 }
  0x55   :  { %1309 = vmatpush3.bf16.msra.mxu0 %v1373_v8 }
  0x58   :  { %1311 = vmatmul.mubr.bf16.vlgmr.msra.gmra.mrb[0].mxu0 %v1375_v9 }
  0x59   :  { %1314 = vmatprep.mubr.bf16.mxu0 %v1376_v10 }
  0x60   :  { %1315 = vmatmul.mubr.bf16.gmra.mrb[4].mxu0 %v1377_v11 }
  0x61   :  { %1318 = vmatprep.mubr.bf16.mxu0 %v1378_v12 }
  0x68   :  { %1319 = vmatmul.mubr.bf16.gmra.mrb[8].mxu0 %v1379_v13 }
  0x69   :  { %1322 = vmatprep.mubr.bf16.mxu0 %v1380_v14 }
  0x70   :  { %1323 = vmatmul.mubr.bf16.gmra.mrb[12].mxu0 %v1381_v15 }
  0x71   :  { %1326 = vmatprep.mubr.bf16.mxu0 %v1382_v16 }
  0x78   :  { %1327 = vmatmul.mubr.bf16.gmra.mrb[16].mxu0 %v1383_v17 }
  0x79   :  { %1330 = vmatprep.mubr.bf16.mxu0 %v1384_v18 }
  0x80   :  { %1331 = vmatmul.mubr.bf16.gmra.mrb[20].mxu0 %v1385_v19 }
  0x81   :  { %1334 = vmatprep.mubr.bf16.mxu0 %v1386_v20 }
  0x88   :  { %1335 = vmatmul.mubr.bf16.gmra.mrb[24].mxu0 %v1387_v21 }
  0x89   :  { %1338 = vmatprep.mubr.bf16.mxu0 %v1388_v22 }
  0x90   :  { %1339 = vmatmul.mubr.bf16.gmra.mrb[28].mxu0 %v1389_v23 }
 0x12b   :  { %v1670_v24 = vpop.f32.mrb[0].mxu0 }
 0x12c   :  { %v1672_v25 = vpop.f32.mrb[1].mxu0  ;;  %v425_v26 = vmul.f32 %v1670_v24, %v1670_v24 }
 0x12d   :  { %v1676_v27 = vpop.f32.mrb[2].mxu0  ;;  %v423_v28 = vmul.f32 %v1672_v25, %v1672_v25 }
 0x12e   :  { %459 = vadd.xlane.f32.xlu0 %v425_v26  ;;  %v1680_v29 = vpop.f32.mrb[3].mxu0  ;;  %v426_v30 = vmul.f32 %v1676_v27, %v1676_v27  ;;  %v1392_v26 = vld [vmem:[#allocation8 + $0x44] ss:$8 sps:$4 sm:$0xff]  }
 0x12f   :  { %455 = vadd.xlane.f32.xlu1 %v423_v28  ;;  %v424_v35 = vmul.f32 %v1680_v29, %v1680_v29  ;;  %919 = vmatprep.mubr.bf16.mxu1 %v1392_v26 }
 0x133   :  { %461 = vadd.xlane.f32.xlu1 %v426_v30  ;;  %v1684_v31 = vpop.f32.mrb[4].mxu0 }
 0x134   :  { %v1686_v32 = vpop.f32.mrb[5].mxu0  ;;  %v429_v33 = vmul.f32 %v1684_v31, %v1684_v31 }
 0x135   :  { %v1690_v34 = vpop.f32.mrb[6].mxu0  ;;  %v427_v37 = vmul.f32 %v1686_v32, %v1686_v32 }
 0x136   :  { %467 = vadd.xlane.f32.xlu0 %v429_v33  ;;  %v1694_v36 = vpop.f32.mrb[7].mxu0  ;;  %v430_v38 = vmul.f32 %v1690_v34, %v1690_v34 }
 0x137   :  { %457 = vadd.xlane.f32.xlu1 %v424_v35  ;;  %v428_v43 = vmul.f32 %v1694_v36, %v1694_v36 }
 0x13a   :  { %463 = vadd.xlane.f32.xlu0 %v427_v37 }
 0x13b   :  { %469 = vadd.xlane.f32.xlu1 %v430_v38  ;;  %v1700_v39 = vpop.f32.mrb[8].mxu0 }
 0x13c   :  { %v1702_v40 = vpop.f32.mrb[9].mxu0  ;;  %v433_v41 = vmul.f32 %v1700_v39, %v1700_v39 }
 0x13d   :  { %v1706_v42 = vpop.f32.mrb[10].mxu0  ;;  %v431_v45 = vmul.f32 %v1702_v40, %v1702_v40 }
 0x13e   :  { %475 = vadd.xlane.f32.xlu0 %v433_v41  ;;  %v1710_v44 = vpop.f32.mrb[11].mxu0  ;;  %v434_v46 = vmul.f32 %v1706_v42, %v1706_v42 }
 0x13f   :  { %465 = vadd.xlane.f32.xlu1 %v428_v43  ;;  %v432_v50 = vmul.f32 %v1710_v44, %v1710_v44 }
 0x142   :  { %471 = vadd.xlane.f32.xlu0 %v431_v45 }
 0x143   :  { %477 = vadd.xlane.f32.xlu1 %v434_v46  ;;  %v1716_v47 = vpop.f32.mrb[12].mxu0 }
 0x144   :  { %v1718_v48 = vpop.f32.mrb[13].mxu0  ;;  %v437_v23 = vmul.f32 %v1716_v47, %v1716_v47 }
 0x145   :  { %v1720_v49 = vpop.f32.mrb[14].mxu0  ;;  %v435_v17 = vmul.f32 %v1718_v48, %v1718_v48 }
 0x146   :  { %v1724_v51 = vpop.f32.mrb[15].mxu0  ;;  %v438_v22 = vmul.f32 %v1720_v49, %v1720_v49 }
 0x147   :  { %473 = vadd.xlane.f32.xlu1 %v432_v50  ;;  %v436_v15 = vmul.f32 %v1724_v51, %v1724_v51 }
 0x14b   :  { %v1726_v52 = vpop.f32.mrb[16].mxu0 }
 0x14c   :  { %v1728_v53 = vpop.f32.mrb[17].mxu0  ;;  %v441_v54 = vmul.f32 %v1726_v52, %v1726_v52 }
 0x14d   :  { %v1732_v55 = vpop.f32.mrb[18].mxu0  ;;  %v439_v58 = vmul.f32 %v1728_v53, %v1728_v53 }
 0x14e   :  { %491 = vadd.xlane.f32.xlu0 %v441_v54  ;;  %v1734_v56 = vpop.f32.mrb[19].mxu0  ;;  %v442_v57 = vmul.f32 %v1732_v55, %v1732_v55 }
 0x14f   :  { %v440_v61 = vmul.f32 %v1734_v56, %v1734_v56 }
 0x150   :  { %493 = vadd.xlane.f32.xlu1 %v442_v57 }
 0x152   :  { %487 = vadd.xlane.f32.xlu0 %v439_v58 }
 0x153   :  { %v1740_v59 = vpop.f32.mrb[20].mxu0 }
 0x154   :  { %v1742_v60 = vpop.f32.mrb[21].mxu0  ;;  %v445_v1 = vmul.f32 %v1740_v59, %v1740_v59 }
 0x155   :  { %v1746_v62 = vpop.f32.mrb[22].mxu0  ;;  %v443_v5 = vmul.f32 %v1742_v60, %v1742_v60 }
 0x156   :  { %489 = vadd.xlane.f32.xlu0 %v440_v61  ;;  %v1748_v63 = vpop.f32.mrb[23].mxu0  ;;  %v446_v0 = vmul.f32 %v1746_v62, %v1746_v62 }
 0x157   :  { %v444_v2 = vmul.f32 %v1748_v63, %v1748_v63 }
 0x158   :  { %501 = vadd.xlane.f32.xlu1 %v446_v0 }
 0x15a   :  { %499 = vadd.xlane.f32.xlu0 %v445_v1 }
 0x15b   :  { %v1756_v3 = vpop.f32.mrb[24].mxu0 }
 0x15c   :  { %497 = vadd.xlane.f32.xlu1 %v444_v2  ;;  %v1758_v4 = vpop.f32.mrb[25].mxu0  ;;  %v449_v9 = vmul.f32 %v1756_v3, %v1756_v3 }
 0x15d   :  { %v1762_v6 = vpop.f32.mrb[26].mxu0  ;;  %v447_v12 = vmul.f32 %v1758_v4, %v1758_v4 }
 0x15e   :  { %495 = vadd.xlane.f32.xlu0 %v443_v5  ;;  %v1764_v7 = vpop.f32.mrb[27].mxu0  ;;  %v450_v8 = vmul.f32 %v1762_v6, %v1762_v6 }
 0x15f   :  { %v448_v10 = vmul.f32 %v1764_v7, %v1764_v7 }
 0x160   :  { %509 = vadd.xlane.f32.xlu1 %v450_v8 }
 0x162   :  { %507 = vadd.xlane.f32.xlu0 %v449_v9 }
 0x163   :  { %v1772_v11 = vpop.f32.mrb[28].mxu0 }
 0x164   :  { %505 = vadd.xlane.f32.xlu1 %v448_v10  ;;  %v1776_v13 = vpop.f32.mrb[29].mxu0  ;;  %v453_v21 = vmul.f32 %v1772_v11, %v1772_v11 }
 0x165   :  { %v1778_v14 = vpop.f32.mrb[30].mxu0  ;;  %v451_v19 = vmul.f32 %v1776_v13, %v1776_v13 }
 0x166   :  { %503 = vadd.xlane.f32.xlu0 %v447_v12  ;;  %v1782_v16 = vpop.f32.mrb[31].mxu0  ;;  %v454_v20 = vmul.f32 %v1778_v14, %v1778_v14 }
 0x167   :  { %v452_v18 = vmul.f32 %v1782_v16, %v1782_v16 }
 0x168   :  { %481 = vadd.xlane.f32.xlu1 %v436_v15 }
 0x16a   :  { %479 = vadd.xlane.f32.xlu0 %v435_v17 }
 0x16c   :  { %513 = vadd.xlane.f32.xlu1 %v452_v18 }
 0x16e   :  { %511 = vadd.xlane.f32.xlu0 %v451_v19  ;;  %v1416_v19 = vld [vmem:[#allocation8 + $0x4] ss:$8 sps:$4 sm:$0xff]  }
 0x16f   :  { %887 = vmatprep.mubr.bf16.mxu0 %v1416_v19 }
 0x170   :  { %517 = vadd.xlane.f32.xlu1 %v454_v20 }
 0x172   :  { %515 = vadd.xlane.f32.xlu0 %v453_v21 }
 0x174   :  { %485 = vadd.xlane.f32.xlu1 %v438_v22 }
 0x176   :  { %483 = vadd.xlane.f32.xlu0 %v437_v23 }
 0x1bb   :  { %v460_v28 = vpop.xlane.xlu0 %459 }
 0x1bc   :  { %v456_v30 = vpop.xlane.xlu1 %455  ;;  %v521_v33 = vmax.f32 %v460_v28, 1e-24 }
 0x1bd   :  { %v519_v37 = vmax.f32 %v456_v30, 1e-24 }
 0x1be   :  { %1438 = vrsqrt.f32 %v521_v33 }
 0x1c0   :  { %v462_v35 = vpop.xlane.xlu1 %461 }
 0x1c1   :  { %v522_v38 = vmax.f32 %v462_v35, 1e-24 }
 0x1c3   :  { %1440 = vrsqrt.f32 %v522_v38  ;;  %v468_v41 = vpop.xlane.xlu0 %467 }
 0x1c4   :  { %v458_v43 = vpop.xlane.xlu1 %457  ;;  %1442 = vrsqrt.f32 %v519_v37  ;;  %v525_v45 = vmax.f32 %v468_v41, 1e-24 }
 0x1c5   :  { %v520_v46 = vmax.f32 %v458_v43, 1e-24 }
 0x1c7   :  { %1444 = vrsqrt.f32 %v520_v46  ;;  %v464_v50 = vpop.xlane.xlu0 %463 }
 0x1c8   :  { %v470_v54 = vpop.xlane.xlu1 %469  ;;  %1446 = vrsqrt.f32 %v525_v45  ;;  %v523_v57 = vmax.f32 %v464_v50, 1e-24  ;;  %v1439_v61 = vpop.eup %1438 }
 0x1c9   :  { %v526_v58 = vmax.f32 %v470_v54, 1e-24  ;;  %v585_v9 = vmul.f32 %v1439_v61, %v1670_v24 }
 0x1cb   :  { %1448 = vrsqrt.f32 %v526_v58  ;;  %v476_v0 = vpop.xlane.xlu0 %475 }
 0x1cc   :  { %v466_v1 = vpop.xlane.xlu1 %465  ;;  %1450 = vrsqrt.f32 %v523_v57  ;;  %v529_v5 = vmax.f32 %v476_v0, 1e-24 }
 0x1cd   :  { %v1441_v2 = vpop.eup %1440  ;;  %v524_v8 = vmax.f32 %v466_v1, 1e-24 }
 0x1ce   :  { %v586_v10 = vmul.f32 %v1441_v2, %v1676_v27  ;;  %v1443_v12 = vpop.eup %1442 }
 0x1cf   :  { %1452 = vrsqrt.f32 %v524_v8  ;;  %v472_v15 = vpop.xlane.xlu0 %471  ;;  %v583_v23 = vmul.f32 %v1443_v12, %v1672_v25 }
 0x1d0   :  { %v478_v17 = vpop.xlane.xlu1 %477  ;;  %v1800_v18 = vpack.c.bf16 %v586_v10, %v585_v9  ;;  %1454 = vrsqrt.f32 %v529_v5  ;;  %v527_v21 = vmax.f32 %v472_v15, 1e-24 }
 0x1d1   :  { %v1445_v20 = vpop.eup %1444  ;;  %v530_v22 = vmax.f32 %v478_v17, 1e-24 }
 0x1d2   :  { %v584_v26 = vmul.f32 %v1445_v20, %v1680_v29  ;;  %v1447_v28 = vpop.eup %1446 }
 0x1d3   :  { %1456 = vrsqrt.f32 %v530_v22  ;;  %v589_v35 = vmul.f32 %v1447_v28, %v1684_v31 }
 0x1d4   :  { %v474_v24 = vpop.xlane.xlu1 %473  ;;  %v1804_v27 = vpack.c.bf16 %v584_v26, %v583_v23  ;;  %1458 = vrsqrt.f32 %v527_v21 }
 0x1d5   :  { %v1449_v30 = vpop.eup %1448  ;;  %v528_v33 = vmax.f32 %v474_v24, 1e-24 }
 0x1d6   :  { %v590_v37 = vmul.f32 %v1449_v30, %v1690_v34  ;;  %v1451_v38 = vpop.eup %1450 }
 0x1d7   :  { %1460 = vrsqrt.f32 %v528_v33  ;;  %v587_v29 = vmul.f32 %v1451_v38, %v1686_v32 }
 0x1d8   :  { %v1808_v41 = vpack.c.bf16 %v590_v37, %v589_v35 }
 0x1d9   :  { %v1453_v25 = vpop.eup %1452 }
 0x1da   :  { %v588_v43 = vmul.f32 %v1453_v25, %v1694_v36  ;;  %v1455_v45 = vpop.eup %1454 }
 0x1db   :  { %v492_v46 = vpop.xlane.xlu0 %491  ;;  %v593_v34 = vmul.f32 %v1455_v45, %v1700_v39 }
 0x1dc   :  { %v537_v50 = vmax.f32 %v492_v46, 1e-24  ;;  %v1812_v54 = vpack.c.bf16 %v588_v43, %v587_v29 }
 0x1dd   :  { %v1457_v57 = vpop.eup %1456  ;;  %v494_v58 = vpop.xlane.xlu1 %493 }
 0x1de   :  { %1462 = vrsqrt.f32 %v537_v50  ;;  %v538_v31 = vmax.f32 %v494_v58, 1e-24  ;;  %v594_v61 = vmul.f32 %v1457_v57, %v1706_v42  ;;  %v1459_v0 = vpop.eup %1458 }
 0x1df   :  { %v488_v1 = vpop.xlane.xlu0 %487  ;;  %v591_v5 = vmul.f32 %v1459_v0, %v1702_v40 }
 0x1e0   :  { %1464 = vrsqrt.f32 %v538_v31  ;;  %v535_v2 = vmax.f32 %v488_v1, 1e-24  ;;  %v1816_v32 = vpack.c.bf16 %v594_v61, %v593_v34 }
 0x1e1   :  { %v1461_v36 = vpop.eup %1460 }
 0x1e2   :  { %v592_v8 = vmul.f32 %v1461_v36, %v1710_v44  ;;  %1466 = vrsqrt.f32 %v535_v2 }
 0x1e3   :  { %v490_v9 = vpop.xlane.xlu0 %489 }
 0x1e4   :  { %v536_v10 = vmax.f32 %v490_v9, 1e-24  ;;  %v1820_v12 = vpack.c.bf16 %v592_v8, %v591_v5 }
 0x1e5   :  { %v502_v15 = vpop.xlane.xlu1 %501 }
 0x1e6   :  { %1468 = vrsqrt.f32 %v536_v10  ;;  %v542_v39 = vmax.f32 %v502_v15, 1e-24 }
 0x1e7   :  { %v500_v42 = vpop.xlane.xlu0 %499 }
 0x1e8   :  { %v1463_v17 = vpop.eup %1462  ;;  %1470 = vrsqrt.f32 %v542_v39  ;;  %v541_v19 = vmax.f32 %v500_v42, 1e-24 }
 0x1e9   :  { %v498_v20 = vpop.xlane.xlu1 %497  ;;  %v601_v40 = vmul.f32 %v1463_v17, %v1726_v52 }
 0x1ea   :  { %v1465_v21 = vpop.eup %1464  ;;  %1472 = vrsqrt.f32 %v541_v19  ;;  %v540_v22 = vmax.f32 %v498_v20, 1e-24 }
 0x1eb   :  { %v496_v23 = vpop.xlane.xlu0 %495  ;;  %v602_v44 = vmul.f32 %v1465_v21, %v1732_v55 }
 0x1ec   :  { %1474 = vrsqrt.f32 %v540_v22  ;;  %v539_v26 = vmax.f32 %v496_v23, 1e-24  ;;  %v1467_v30 = vpop.eup %1466 }
 0x1ed   :  { %v510_v28 = vpop.xlane.xlu1 %509  ;;  %v624_v24 = vpack.c.bf16 %v602_v44, %v601_v40  ;;  %v599_v29 = vmul.f32 %v1467_v30, %v1728_v53 }
 0x1ee   :  { %1476 = vrsqrt.f32 %v539_v26  ;;  %v546_v33 = vmax.f32 %v510_v28, 1e-24 }
 0x1ef   :  { %v508_v35 = vpop.xlane.xlu0 %507 }
 0x1f0   :  { %v1469_v37 = vpop.eup %1468  ;;  %1478 = vrsqrt.f32 %v546_v33  ;;  %v545_v38 = vmax.f32 %v508_v35, 1e-24 }
 0x1f1   :  { %v506_v25 = vpop.xlane.xlu1 %505  ;;  %v600_v43 = vmul.f32 %v1469_v37, %v1734_v56 }
 0x1f2   :  { %v1471_v45 = vpop.eup %1470  ;;  %1480 = vrsqrt.f32 %v545_v38  ;;  %v544_v52 = vmax.f32 %v506_v25, 1e-24 }
 0x1f3   :  { %v504_v55 = vpop.xlane.xlu0 %503  ;;  %v623_v46 = vpack.c.bf16 %v600_v43, %v599_v29  ;;  %v606_v34 = vmul.f32 %v1471_v45, %v1746_v62  ;;  %v1390_v45 = vld [vmem:[#allocation8 + $0x40] ss:$8 sps:$4 sm:$0xff]  }
 0x1f4   :  { %v1473_v50 = vpop.eup %1472  ;;  %1482 = vrsqrt.f32 %v544_v52  ;;  %v543_v57 = vmax.f32 %v504_v55, 1e-24  ;;  %v1414_v52 = vld [vmem:[#allocation8] ss:$8 sps:$4 sm:$0xff]   ;;  %v1393_v55 = vld [vmem:[#allocation8 + $0x54] ss:$8 sps:$4 sm:$0xff]  }
 0x1f5   :  { %1182 = vmatprep.subr.bf16.mxu0 %v623_v46  ;;  %1342 = vmatprep.subr.bf16.mxu1 %v623_v46  ;;  %v482_v58 = vpop.xlane.xlu1 %481  ;;  %v605_v31 = vmul.f32 %v1473_v50, %v1740_v59  ;;  %v1422_v46 = vld [vmem:[#allocation8 + $0x10] ss:$8 sps:$4 sm:$0xff]   ;;  %v1396_v50 = vld [vmem:[#allocation8 + $0x64] ss:$8 sps:$4 sm:$0xff]  }
 0x1f6   :  { %v1475_v61 = vpop.eup %1474  ;;  %1484 = vrsqrt.f32 %v543_v57  ;;  %v532_v53 = vmax.f32 %v482_v58, 1e-24  ;;  %1183 = vmatpush3.bf16.msra.mxu0 %v1804_v27  ;;  %1350 = vmatpush3.bf16.msra.mxu1 %v1804_v27  ;;  %v1426_v57 = vld [vmem:[#allocation8 + $0x24] ss:$8 sps:$4 sm:$0xff]   ;;  %v1399_v58 = vld [vmem:[#allocation8 + $0x74] ss:$8 sps:$4 sm:$0xff]  }
 0x1f7   :  { %1184 = vmatprep.subr.bf16.mxu0 %v624_v24  ;;  %1343 = vmatprep.subr.bf16.mxu1 %v624_v24  ;;  %v480_v56 = vpop.xlane.xlu0 %479  ;;  %v626_v0 = vpack.c.bf16 %v606_v34, %v605_v31  ;;  %v604_v59 = vmul.f32 %v1475_v61, %v1748_v63  ;;  %v1432_v31 = vld [vmem:[#allocation8 + $0x34] ss:$8 sps:$4 sm:$0xff]   ;;  %v1401_v34 = vld [vmem:[#allocation8 + $0x70] ss:$8 sps:$4 sm:$0xff]  }
 0x1f8   :  { %v1477_v1 = vpop.eup %1476  ;;  %1486 = vrsqrt.f32 %v532_v53  ;;  %v531_v2 = vmax.f32 %v480_v56, 1e-24  ;;  %v1434_v61 = vld [vmem:[#allocation8 + $0x30] ss:$8 sps:$4 sm:$0xff]   ;;  %v1402_v53 = vld [vmem:[#allocation8 + $0x84] ss:$8 sps:$4 sm:$0xff]  }
 0x1f9   :  { %v514_v36 = vpop.xlane.xlu1 %513  ;;  %v603_v5 = vmul.f32 %v1477_v1, %v1742_v60  ;;  %v1404_v56 = vld [vmem:[#allocation8 + $0x80] ss:$8 sps:$4 sm:$0xff]   ;;  %v1407_v1 = vld [vmem:[#allocation8 + $0x90] ss:$8 sps:$4 sm:$0xff]  }
 0x1fa   :  { %v1479_v62 = vpop.eup %1478  ;;  %1488 = vrsqrt.f32 %v531_v2  ;;  %v548_v8 = vmax.f32 %v514_v36, 1e-24  ;;  %1185 = vmatpush3.bf16.msra.mxu0 %v1800_v18  ;;  %1351 = vmatpush3.bf16.msra.mxu1 %v1800_v18  ;;  %v1408_v2 = vld [vmem:[#allocation8 + $0xa4] ss:$8 sps:$4 sm:$0xff]   ;;  %v1410_v36 = vld [vmem:[#allocation8 + $0xa0] ss:$8 sps:$4 sm:$0xff]  }
 0x1fb   :  { %v512_v27 = vpop.xlane.xlu0 %511  ;;  %v625_v9 = vpack.c.bf16 %v604_v59, %v603_v5  ;;  %v610_v60 = vmul.f32 %v1479_v62, %v1762_v6  ;;  %v1411_v5 = vld [vmem:[#allocation8 + $0xb4] ss:$8 sps:$4 sm:$0xff]   ;;  %v1413_v59 = vld [vmem:[#allocation8 + $0xb0] ss:$8 sps:$4 sm:$0xff]   ;;  %v1417_v62 = vld [vmem:[#allocation8 + $0xc4] ss:$8 sps:$4 sm:$0xff]  }
 0x1fc   :  { %v1481_v10 = vpop.eup %1480  ;;  %1490 = vrsqrt.f32 %v548_v8  ;;  %v547_v15 = vmax.f32 %v512_v27, 1e-24  ;;  %v1419_v8 = vld [vmem:[#allocation8 + $0xc0] ss:$8 sps:$4 sm:$0xff]   ;;  %v1423_v27 = vld [vmem:[#allocation8 + $0xd4] ss:$8 sps:$4 sm:$0xff]  }
 0x1fd   :  { %1186 = vmatprep.subr.bf16.mxu0 %v625_v9  ;;  %1344 = vmatprep.subr.bf16.mxu1 %v625_v9  ;;  %v518_v39 = vpop.xlane.xlu1 %517  ;;  %v609_v42 = vmul.f32 %v1481_v10, %v1756_v3  ;;  %v1425_v9 = vld [vmem:[#allocation8 + $0xd0] ss:$8 sps:$4 sm:$0xff]   ;;  %v1429_v10 = vld [vmem:[#allocation8 + $0xe4] ss:$8 sps:$4 sm:$0xff]  }
 0x1fe   :  { %v1483_v63 = vpop.eup %1482  ;;  %1492 = vrsqrt.f32 %v547_v15  ;;  %v550_v17 = vmax.f32 %v518_v39, 1e-24  ;;  %1187 = vmatpush3.bf16.msra.mxu0 %v1812_v54  ;;  %1352 = vmatpush3.bf16.msra.mxu1 %v1812_v54  ;;  %v1431_v15 = vld [vmem:[#allocation8 + $0xe0] ss:$8 sps:$4 sm:$0xff]   ;;  %v1435_v39 = vld [vmem:[#allocation8 + $0xf4] ss:$8 sps:$4 sm:$0xff]  }
 0x1ff   :  { %1188 = vmatprep.subr.bf16.mxu0 %v626_v0  ;;  %1345 = vmatprep.subr.bf16.mxu1 %v626_v0  ;;  %v516_v18 = vpop.xlane.xlu0 %515  ;;  %v628_v19 = vpack.c.bf16 %v610_v60, %v609_v42  ;;  %v608_v3 = vmul.f32 %v1483_v63, %v1764_v7  ;;  %v1405_v0 = vld [vmem:[#allocation8 + $0x94] ss:$8 sps:$4 sm:$0xff]   ;;  %v1437_v42 = vld [vmem:[#allocation8 + $0xf0] ss:$8 sps:$4 sm:$0xff]  }
 0x200   :  { %v1485_v20 = vpop.eup %1484  ;;  %1494 = vrsqrt.f32 %v550_v17  ;;  %v549_v21 = vmax.f32 %v516_v18, 1e-24 }
 0x201   :  { %v486_v22 = vpop.xlane.xlu1 %485  ;;  %v607_v23 = vmul.f32 %v1485_v20, %v1758_v4 }
 0x202   :  { %v1487_v6 = vpop.eup %1486  ;;  %1496 = vrsqrt.f32 %v549_v21  ;;  %v534_v40 = vmax.f32 %v486_v22, 1e-24  ;;  %1189 = vmatpush3.bf16.msra.mxu0 %v1808_v41  ;;  %1353 = vmatpush3.bf16.msra.mxu1 %v1808_v41 }
 0x203   :  { %v484_v54 = vpop.xlane.xlu0 %483  ;;  %v627_v44 = vpack.c.bf16 %v608_v3, %v607_v23  ;;  %v596_v4 = vmul.f32 %v1487_v6, %v1724_v51 }
 0x204   :  { %v1489_v26 = vpop.eup %1488  ;;  %1498 = vrsqrt.f32 %v534_v40  ;;  %v533_v28 = vmax.f32 %v484_v54, 1e-24 }
 0x205   :  { %1190 = vmatprep.subr.bf16.mxu0 %v627_v44  ;;  %1346 = vmatprep.subr.bf16.mxu1 %v627_v44  ;;  %v595_v24 = vmul.f32 %v1489_v26, %v1718_v48 }
 0x206   :  { %v1491_v30 = vpop.eup %1490  ;;  %1500 = vrsqrt.f32 %v533_v28  ;;  %1191 = vmatpush3.bf16.msra.mxu0 %v1820_v12  ;;  %1354 = vmatpush3.bf16.msra.mxu1 %v1820_v12 }
 0x207   :  { %1192 = vmatprep.subr.bf16.mxu0 %v628_v19  ;;  %1347 = vmatprep.subr.bf16.mxu1 %v628_v19  ;;  %v621_v7 = vpack.c.bf16 %v596_v4, %v595_v24  ;;  %v612_v35 = vmul.f32 %v1491_v30, %v1782_v16 }
 0x208   :  { %v1493_v41 = vpop.eup %1492 }
 0x209   :  { %v611_v33 = vmul.f32 %v1493_v41, %v1776_v13 }
 0x20a   :  { %v1495_v37 = vpop.eup %1494  ;;  %1193 = vmatpush3.bf16.msra.mxu0 %v1816_v32  ;;  %1355 = vmatpush3.bf16.msra.mxu1 %v1816_v32 }
 0x20b   :  { %v629_v48 = vpack.c.bf16 %v612_v35, %v611_v33  ;;  %v614_v12 = vmul.f32 %v1495_v37, %v1778_v14  ;;  %v1395_v14 = vld [vmem:[#allocation8 + $0x50] ss:$8 sps:$4 sm:$0xff]  }
 0x20c   :  { %v1497_v51 = vpop.eup %1496 }
 0x20d   :  { %1194 = vmatprep.subr.bf16.mxu0 %v629_v48  ;;  %1348 = vmatprep.subr.bf16.mxu1 %v629_v48  ;;  %v613_v38 = vmul.f32 %v1497_v51, %v1772_v11  ;;  %v1420_v11 = vld [vmem:[#allocation8 + $0x14] ss:$8 sps:$4 sm:$0xff]  }
 0x20e   :  { %v1499_v25 = vpop.eup %1498  ;;  %1195 = vmatpush3.bf16.msra.mxu0 %v621_v7  ;;  %1356 = vmatpush3.bf16.msra.mxu1 %v621_v7 }
 0x20f   :  { %v630_v29 = vpack.c.bf16 %v614_v12, %v613_v38  ;;  %v598_v43 = vmul.f32 %v1499_v25, %v1720_v49  ;;  %v1428_v49 = vld [vmem:[#allocation8 + $0x20] ss:$8 sps:$4 sm:$0xff]  }
 0x210   :  { %v1501_v13 = vpop.eup %1500 }
 0x211   :  { %1196 = vmatprep.subr.bf16.mxu0 %v630_v29  ;;  %1349 = vmatprep.subr.bf16.mxu1 %v630_v29  ;;  %v597_v16 = vmul.f32 %v1501_v13, %v1716_v47  ;;  %v1398_v47 = vld [vmem:[#allocation8 + $0x60] ss:$8 sps:$4 sm:$0xff]  }
 0x213   :  { %v622_v32 = vpack.c.bf16 %v598_v43, %v597_v16 }
 0x215   :  { %1197 = vmatpush3.bf16.msra.mxu0 %v622_v32  ;;  %1357 = vmatpush3.bf16.msra.mxu1 %v622_v32 }
 0x218   :  { %920 = vmatmul.mubr.bf16.vlgmr.msra.gmra.mrb[0].mxu1 %v1390_v45  ;;  %888 = vmatmul.mubr.bf16.vlgmr.msra.gmra.mrb[32].mxu0 %v1414_v52 }
 0x219   :  { %927 = vmatprep.mubr.bf16.mxu1 %v1393_v55  ;;  %895 = vmatprep.mubr.bf16.mxu0 %v1420_v11 }
 0x220   :  { %928 = vmatmul.mubr.bf16.gmra.mrb[4].mxu1 %v1395_v14  ;;  %896 = vmatmul.mubr.bf16.gmra.mrb[36].mxu0 %v1422_v46 }
 0x221   :  { %935 = vmatprep.mubr.bf16.mxu1 %v1396_v50  ;;  %903 = vmatprep.mubr.bf16.mxu0 %v1426_v57 }
 0x228   :  { %936 = vmatmul.mubr.bf16.gmra.mrb[8].mxu1 %v1398_v47  ;;  %904 = vmatmul.mubr.bf16.gmra.mrb[40].mxu0 %v1428_v49 }
 0x229   :  { %943 = vmatprep.mubr.bf16.mxu1 %v1399_v58  ;;  %911 = vmatprep.mubr.bf16.mxu0 %v1432_v31 }
 0x230   :  { %944 = vmatmul.mubr.bf16.gmra.mrb[12].mxu1 %v1401_v34  ;;  %912 = vmatmul.mubr.bf16.gmra.mrb[44].mxu0 %v1434_v61 }
 0x231   :  { %951 = vmatprep.mubr.bf16.mxu1 %v1402_v53 }
 0x238   :  { %952 = vmatmul.mubr.bf16.gmra.mrb[16].mxu1 %v1404_v56 }
 0x239   :  { %959 = vmatprep.mubr.bf16.mxu1 %v1405_v0 }
 0x240   :  { %960 = vmatmul.mubr.bf16.gmra.mrb[20].mxu1 %v1407_v1 }
 0x241   :  { %967 = vmatprep.mubr.bf16.mxu1 %v1408_v2 }
 0x248   :  { %968 = vmatmul.mubr.bf16.gmra.mrb[24].mxu1 %v1410_v36 }
 0x249   :  { %975 = vmatprep.mubr.bf16.mxu1 %v1411_v5 }
 0x250   :  { %976 = vmatmul.mubr.bf16.gmra.mrb[28].mxu1 %v1413_v59 }
 0x251   :  { %983 = vmatprep.mubr.bf16.mxu1 %v1417_v62 }
 0x258   :  { %984 = vmatmul.mubr.bf16.gmra.mrb[32].mxu1 %v1419_v8 }
 0x259   :  { %991 = vmatprep.mubr.bf16.mxu1 %v1423_v27 }
 0x260   :  { %992 = vmatmul.mubr.bf16.gmra.mrb[36].mxu1 %v1425_v9 }
 0x261   :  { %999 = vmatprep.mubr.bf16.mxu1 %v1429_v10 }
 0x268   :  { %1000 = vmatmul.mubr.bf16.gmra.mrb[40].mxu1 %v1431_v15 }
 0x269   :  { %1007 = vmatprep.mubr.bf16.mxu1 %v1435_v39 }
 0x270   :  { %1008 = vmatmul.mubr.bf16.gmra.mrb[44].mxu1 %v1437_v42 }
 0x2eb   :  { %v1222_v60 = vpop.f32.mrb[0].mxu1  ;;  %v1198_v63 = vpop.f32.mrb[32].mxu0 }
 0x2ec   :  { %v1223_v17 = vpop.f32.mrb[1].mxu1  ;;  %v1199_v18 = vpop.f32.mrb[33].mxu0 }
 0x2ed   :  { %v1224_v19 = vadd.f32 %v1223_v17, %v1222_v60  ;;  %v1225_v20 = vpop.f32.mrb[2].mxu1  ;;  %v1200_v21 = vadd.f32 %v1199_v18, %v1198_v63  ;;  %v1201_v22 = vpop.f32.mrb[34].mxu0 }
 0x2ee   :  { %v1226_v23 = vpop.f32.mrb[3].mxu1  ;;  %v1202_v3 = vpop.f32.mrb[35].mxu0 }
 0x2ef   :  { %v1024_v6 = vmul.f32 1.8, %v1224_v19  ;;  %v1227_v40 = vadd.f32 %v1226_v23, %v1225_v20  ;;  %v1016_v54 = vmul.f32 1.8, %v1200_v21  ;;  %v1203_v44 = vadd.f32 %v1202_v3, %v1201_v22 }
 0x2f1   :  { %1056 = vst [vmem:[#allocation9 + $0x40] sm:$0xff] %v1024_v6  ;;  %v1025_v26 = vmul.f32 1.8, %v1227_v40  ;;  %1048 = vst [vmem:[#allocation9] sm:$0xff] %v1016_v54  ;;  %v1017_v28 = vmul.f32 1.8, %v1203_v44 }
 0x2f3   :  { %1057 = vst [vmem:[#allocation9 + $0x48] sm:$0xff] %v1025_v26  ;;  %v1228_v24 = vpop.f32.mrb[4].mxu1  ;;  %1049 = vst [vmem:[#allocation9 + $0x8] sm:$0xff] %v1017_v28  ;;  %v1204_v4 = vpop.f32.mrb[36].mxu0 }
 0x2f4   :  { %v1229_v30 = vpop.f32.mrb[5].mxu1  ;;  %v1205_v7 = vpop.f32.mrb[37].mxu0 }
 0x2f5   :  { %v1230_v41 = vadd.f32 %v1229_v30, %v1228_v24  ;;  %v1231_v33 = vpop.f32.mrb[6].mxu1  ;;  %v1206_v35 = vadd.f32 %v1205_v7, %v1204_v4  ;;  %v1207_v37 = vpop.f32.mrb[38].mxu0 }
 0x2f6   :  { %v1232_v48 = vpop.f32.mrb[7].mxu1  ;;  %v1208_v51 = vpop.f32.mrb[39].mxu0 }
 0x2f7   :  { %v1026_v38 = vmul.f32 1.8, %v1230_v41  ;;  %v1233_v12 = vadd.f32 %v1232_v48, %v1231_v33  ;;  %v1018_v25 = vmul.f32 1.8, %v1206_v35  ;;  %v1209_v29 = vadd.f32 %v1208_v51, %v1207_v37 }
 0x2f9   :  { %1058 = vst [vmem:[#allocation9 + $0x50] sm:$0xff] %v1026_v38  ;;  %v1027_v13 = vmul.f32 1.8, %v1233_v12  ;;  %1050 = vst [vmem:[#allocation9 + $0x10] sm:$0xff] %v1018_v25  ;;  %v1019_v16 = vmul.f32 1.8, %v1209_v29 }
 0x2fb   :  { %1059 = vst [vmem:[#allocation9 + $0x58] sm:$0xff] %v1027_v13  ;;  %v1234_v43 = vpop.f32.mrb[8].mxu1  ;;  %1051 = vst [vmem:[#allocation9 + $0x18] sm:$0xff] %v1019_v16  ;;  %v1210_v32 = vpop.f32.mrb[40].mxu0 }
 0x2fc   :  { %v1235_v45 = vpop.f32.mrb[9].mxu1  ;;  %v1211_v52 = vpop.f32.mrb[41].mxu0 }
 0x2fd   :  { %v1236_v55 = vadd.f32 %v1235_v45, %v1234_v43  ;;  %v1237_v11 = vpop.f32.mrb[10].mxu1  ;;  %v1212_v14 = vadd.f32 %v1211_v52, %v1210_v32  ;;  %v1213_v46 = vpop.f32.mrb[42].mxu0 }
 0x2fe   :  { %v1238_v50 = vpop.f32.mrb[11].mxu1  ;;  %v1214_v57 = vpop.f32.mrb[43].mxu0 }
 0x2ff   :  { %v1028_v47 = vmul.f32 1.8, %v1236_v55  ;;  %v1239_v49 = vadd.f32 %v1238_v50, %v1237_v11  ;;  %v1020_v58 = vmul.f32 1.8, %v1212_v14  ;;  %v1215_v31 = vadd.f32 %v1214_v57, %v1213_v46 }
 0x301   :  { %1060 = vst [vmem:[#allocation9 + $0x60] sm:$0xff] %v1028_v47  ;;  %v1029_v34 = vmul.f32 1.8, %v1239_v49  ;;  %1052 = vst [vmem:[#allocation9 + $0x20] sm:$0xff] %v1020_v58  ;;  %v1021_v61 = vmul.f32 1.8, %v1215_v31 }
 0x303   :  { %1061 = vst [vmem:[#allocation9 + $0x68] sm:$0xff] %v1029_v34  ;;  %v1240_v53 = vpop.f32.mrb[12].mxu1  ;;  %1053 = vst [vmem:[#allocation9 + $0x28] sm:$0xff] %v1021_v61  ;;  %v1216_v56 = vpop.f32.mrb[44].mxu0 }
 0x304   :  { %v1241_v0 = vpop.f32.mrb[13].mxu1  ;;  %v1217_v1 = vpop.f32.mrb[45].mxu0 }
 0x305   :  { %v1242_v2 = vadd.f32 %v1241_v0, %v1240_v53  ;;  %v1243_v36 = vpop.f32.mrb[14].mxu1  ;;  %v1218_v5 = vadd.f32 %v1217_v1, %v1216_v56  ;;  %v1219_v59 = vpop.f32.mrb[46].mxu0 }
 0x306   :  { %v1244_v62 = vpop.f32.mrb[15].mxu1  ;;  %v1220_v8 = vpop.f32.mrb[47].mxu0 }
 0x307   :  { %v1030_v27 = vmul.f32 1.8, %v1242_v2  ;;  %v1245_v9 = vadd.f32 %v1244_v62, %v1243_v36  ;;  %v1022_v10 = vmul.f32 1.8, %v1218_v5  ;;  %v1221_v15 = vadd.f32 %v1220_v8, %v1219_v59 }
 0x309   :  { %1062 = vst [vmem:[#allocation9 + $0x70] sm:$0xff] %v1030_v27  ;;  %v1031_v39 = vmul.f32 1.8, %v1245_v9  ;;  %1054 = vst [vmem:[#allocation9 + $0x30] sm:$0xff] %v1022_v10  ;;  %v1023_v42 = vmul.f32 1.8, %v1221_v15 }
 0x30b   :  { %1063 = vst [vmem:[#allocation9 + $0x78] sm:$0xff] %v1031_v39  ;;  %v1246_v60 = vpop.f32.mrb[16].mxu1  ;;  %1055 = vst [vmem:[#allocation9 + $0x38] sm:$0xff] %v1023_v42 }
 0x30c   :  { %v1247_v63 = vpop.f32.mrb[17].mxu1 }
 0x30d   :  { %v1248_v17 = vadd.f32 %v1247_v63, %v1246_v60  ;;  %v1249_v18 = vpop.f32.mrb[18].mxu1 }
 0x30e   :  { %v1250_v19 = vpop.f32.mrb[19].mxu1 }
 0x30f   :  { %v1032_v20 = vmul.f32 1.8, %v1248_v17  ;;  %v1251_v21 = vadd.f32 %v1250_v19, %v1249_v18 }
 0x311   :  { %1064 = vst [vmem:[#allocation9 + $0x80] sm:$0xff] %v1032_v20  ;;  %v1033_v22 = vmul.f32 1.8, %v1251_v21 }
 0x313   :  { %1065 = vst [vmem:[#allocation9 + $0x88] sm:$0xff] %v1033_v22  ;;  %v1252_v23 = vpop.f32.mrb[20].mxu1 }
 0x314   :  { %v1253_v3 = vpop.f32.mrb[21].mxu1 }
 0x315   :  { %v1254_v6 = vadd.f32 %v1253_v3, %v1252_v23  ;;  %v1255_v40 = vpop.f32.mrb[22].mxu1 }
 0x316   :  { %v1256_v54 = vpop.f32.mrb[23].mxu1 }
 0x317   :  { %v1034_v44 = vmul.f32 1.8, %v1254_v6  ;;  %v1257_v26 = vadd.f32 %v1256_v54, %v1255_v40 }
 0x319   :  { %1066 = vst [vmem:[#allocation9 + $0x90] sm:$0xff] %v1034_v44  ;;  %v1035_v28 = vmul.f32 1.8, %v1257_v26 }
 0x31b   :  { %1067 = vst [vmem:[#allocation9 + $0x98] sm:$0xff] %v1035_v28  ;;  %v1258_v24 = vpop.f32.mrb[24].mxu1 }
 0x31c   :  { %v1259_v4 = vpop.f32.mrb[25].mxu1 }
 0x31d   :  { %v1260_v30 = vadd.f32 %v1259_v4, %v1258_v24  ;;  %v1261_v7 = vpop.f32.mrb[26].mxu1 }
 0x31e   :  { %v1262_v41 = vpop.f32.mrb[27].mxu1 }
 0x31f   :  { %v1036_v33 = vmul.f32 1.8, %v1260_v30  ;;  %v1263_v35 = vadd.f32 %v1262_v41, %v1261_v7 }
 0x321   :  { %1068 = vst [vmem:[#allocation9 + $0xa0] sm:$0xff] %v1036_v33  ;;  %v1037_v37 = vmul.f32 1.8, %v1263_v35 }
 0x323   :  { %1069 = vst [vmem:[#allocation9 + $0xa8] sm:$0xff] %v1037_v37  ;;  %v1264_v48 = vpop.f32.mrb[28].mxu1 }
 0x324   :  { %v1265_v51 = vpop.f32.mrb[29].mxu1 }
 0x325   :  { %v1266_v38 = vadd.f32 %v1265_v51, %v1264_v48  ;;  %v1267_v12 = vpop.f32.mrb[30].mxu1 }
 0x326   :  { %v1268_v25 = vpop.f32.mrb[31].mxu1 }
 0x327   :  { %v1038_v29 = vmul.f32 1.8, %v1266_v38  ;;  %v1269_v13 = vadd.f32 %v1268_v25, %v1267_v12 }
 0x329   :  { %1070 = vst [vmem:[#allocation9 + $0xb0] sm:$0xff] %v1038_v29  ;;  %v1039_v16 = vmul.f32 1.8, %v1269_v13 }
 0x32b   :  { %1071 = vst [vmem:[#allocation9 + $0xb8] sm:$0xff] %v1039_v16  ;;  %v1270_v43 = vpop.f32.mrb[32].mxu1 }
 0x32c   :  { %v1271_v32 = vpop.f32.mrb[33].mxu1 }
 0x32d   :  { %v1272_v45 = vadd.f32 %v1271_v32, %v1270_v43  ;;  %v1273_v52 = vpop.f32.mrb[34].mxu1 }
 0x32e   :  { %v1274_v55 = vpop.f32.mrb[35].mxu1 }
 0x32f   :  { %v1040_v11 = vmul.f32 1.8, %v1272_v45  ;;  %v1275_v14 = vadd.f32 %v1274_v55, %v1273_v52 }
 0x331   :  { %1072 = vst [vmem:[#allocation9 + $0xc0] sm:$0xff] %v1040_v11  ;;  %v1041_v46 = vmul.f32 1.8, %v1275_v14 }
 0x333   :  { %1073 = vst [vmem:[#allocation9 + $0xc8] sm:$0xff] %v1041_v46  ;;  %v1276_v50 = vpop.f32.mrb[36].mxu1 }
 0x334   :  { %v1277_v57 = vpop.f32.mrb[37].mxu1 }
 0x335   :  { %v1278_v47 = vadd.f32 %v1277_v57, %v1276_v50  ;;  %v1279_v49 = vpop.f32.mrb[38].mxu1 }
 0x336   :  { %v1280_v58 = vpop.f32.mrb[39].mxu1 }
 0x337   :  { %v1042_v31 = vmul.f32 1.8, %v1278_v47  ;;  %v1281_v34 = vadd.f32 %v1280_v58, %v1279_v49 }
 0x339   :  { %1074 = vst [vmem:[#allocation9 + $0xd0] sm:$0xff] %v1042_v31  ;;  %v1043_v61 = vmul.f32 1.8, %v1281_v34 }
 0x33b   :  { %1075 = vst [vmem:[#allocation9 + $0xd8] sm:$0xff] %v1043_v61  ;;  %v1282_v53 = vpop.f32.mrb[40].mxu1 }
 0x33c   :  { %v1283_v56 = vpop.f32.mrb[41].mxu1 }
 0x33d   :  { %v1284_v0 = vadd.f32 %v1283_v56, %v1282_v53  ;;  %v1285_v1 = vpop.f32.mrb[42].mxu1 }
 0x33e   :  { %v1286_v2 = vpop.f32.mrb[43].mxu1 }
 0x33f   :  { %v1044_v36 = vmul.f32 1.8, %v1284_v0  ;;  %v1287_v5 = vadd.f32 %v1286_v2, %v1285_v1 }
 0x341   :  { %1076 = vst [vmem:[#allocation9 + $0xe0] sm:$0xff] %v1044_v36  ;;  %v1045_v59 = vmul.f32 1.8, %v1287_v5 }
 0x343   :  { %1077 = vst [vmem:[#allocation9 + $0xe8] sm:$0xff] %v1045_v59  ;;  %v1288_v62 = vpop.f32.mrb[44].mxu1 }
 0x344   :  { %v1289_v8 = vpop.f32.mrb[45].mxu1 }
 0x345   :  { %v1290_v27 = vadd.f32 %v1289_v8, %v1288_v62  ;;  %v1291_v9 = vpop.f32.mrb[46].mxu1 }
 0x346   :  { %v1292_v10 = vpop.f32.mrb[47].mxu1 }
 0x347   :  { %v1046_v15 = vmul.f32 1.8, %v1290_v27  ;;  %v1293_v39 = vadd.f32 %v1292_v10, %v1291_v9 }
 0x349   :  { %1078 = vst [vmem:[#allocation9 + $0xf0] sm:$0xff] %v1046_v15  ;;  %v1047_v42 = vmul.f32 1.8, %v1293_v39 }
 0x34b   :  { %1079 = vst [vmem:[#allocation9 + $0xf8] sm:$0xff] %v1047_v42 }
 0x34c   :  { %1579 = shalt.err (!%p1576_p0)
}
 0x34d   :  { %s1580_s27 = scalar_lea.hbm %s1872_s3, 4096 }
 0x34e   :  { %p1581_p1 = scmp.ne.s32.totalorder %s1872_s3, %s1580_s27  ;;  %p1584_p2 = scmp.lt.u32.totalorder %s1580_s27, %s1872_s3 }
 0x350   :  { %p1586_p3 = pnand %p1584_p2, %p1581_p1 }
 0x352   :  { %1589 = shalt.err (!%p1586_p3)
}
 0x353   :  { %1095 = dma.vmem_to_hbm [thread:$0]  %s1090_s23, 4096, %s1872_s3, [#allocation5], %s1601_s0, %s1601_s0, %s1602_s15  }
 0x354   :  { %1594 = dma.done.wait [#allocation5], 4096  }
 0x355   :  { %1595 = vsyncadd [#allocation5], 4294963200 }
 0x356   :  { %1099 = vsyncpa [#allocation4], 1 }
 0x357   :  { %1100 = vsyncpa [#allocation7], 1 }
 0x358   :  { %1101 = vsyncpa [#allocation5], 1 }

</bundles_post_ra>
